<compile_context>
chip_gen: v6e
topology: v6e:2x2x1
jax: 0.10.0
libtpu: 0.0.40
codegen_flags: <defaults>
</compile_context>

<pallas_src>
import functools

import numpy as np
import jax
import jax.numpy as jnp
from jax.experimental import pallas as pl
from jax.experimental.pallas import tpu as pltpu

# bf16 on the MXU for the (dead) decoder-block matmuls; f32 accumulation everywhere.
MXU_DTYPE = jnp.bfloat16
LN_EPS = 1e-5


# --------------------------- fused Pallas kernels ---------------------------

def _ln(x, g, b, eps):
    mu = jnp.mean(x, axis=-1, keepdims=True)
    var = jnp.mean((x - mu) ** 2, axis=-1, keepdims=True)
    return (x - mu) * jax.lax.rsqrt(var + eps) * g + b


def _encode_build_kernel(patches_ref, pew_ref, peb_ref, encpos_ref,
                         visidx_ref, maskidx_ref, decpos_ref, dew_ref, deb_ref,
                         masktok_ref, tok_ref, xfull_ref):
    """Per-batch: patch-embed + pos  -> tok; gather visible tokens, decoder_embed,
    add decoder pos, append (mask_token + pos_mask)  -> x_full. All in one VMEM pass."""
    L, _ = encpos_ref.shape
    patches = patches_ref[0]                                        # (L, P)
    tok = (jnp.dot(patches, pew_ref[...], preferred_element_type=jnp.float32)
           + peb_ref[...] + encpos_ref[...])                        # (L, E)
    tok_ref[0] = tok.astype(tok_ref.dtype)

    vis_idx = visidx_ref[0]                                         # (mN, 1) int32
    msk_idx = maskidx_ref[0]                                        # (nM, 1) int32
    mN = vis_idx.shape[0]
    nM = msk_idx.shape[0]
    # In-kernel row gather via one-hot matmul on the MXU (no XLA gather / HBM bounce).
    oh_vis = (jax.lax.broadcasted_iota(jnp.int32, (mN, L), 1) == vis_idx).astype(jnp.float32)
    oh_msk = (jax.lax.broadcasted_iota(jnp.int32, (nM, L), 1) == msk_idx).astype(jnp.float32)

    dec_pos = decpos_ref[...]                                       # (L, C)
    latent = jnp.dot(oh_vis, tok, preferred_element_type=jnp.float32)        # (mN, E)
    pos_vis = jnp.dot(oh_vis, dec_pos, preferred_element_type=jnp.float32)   # (mN, C)
    pos_msk = jnp.dot(oh_msk, dec_pos, preferred_element_type=jnp.float32)   # (nM, C)

    x_vis = (jnp.dot(latent, dew_ref[...], preferred_element_type=jnp.float32)
             + deb_ref[...] + pos_vis)                              # (mN, C)
    x_msk = masktok_ref[...] + pos_msk                              # (nM, C)
    xfull_ref[0, 0:mN, :] = x_vis.astype(xfull_ref.dtype)
    xfull_ref[0, mN:mN + nM, :] = x_msk.astype(xfull_ref.dtype)


def encode_and_build(patches, vis_idx, mask_idx, params):
    B, L, P = patches.shape
    E = params["pe_w"].shape[1]
    C = params["de_w"].shape[1]
    mN = vis_idx.shape[1]
    nM = mask_idx.shape[1]
    return pl.pallas_call(
        _encode_build_kernel,
        grid=(B,),
        in_specs=[
            pl.BlockSpec((1, L, P), lambda b: (b, 0, 0)),       # patches
            pl.BlockSpec((P, E), lambda b: (0, 0)),             # pe_w
            pl.BlockSpec((1, E), lambda b: (0, 0)),             # pe_b
            pl.BlockSpec((L, E), lambda b: (0, 0)),             # enc_pos (no cls)
            pl.BlockSpec((1, mN, 1), lambda b: (b, 0, 0)),      # vis_idx
            pl.BlockSpec((1, nM, 1), lambda b: (b, 0, 0)),      # mask_idx
            pl.BlockSpec((L, C), lambda b: (0, 0)),             # dec_pos (no cls)
            pl.BlockSpec((E, C), lambda b: (0, 0)),             # de_w
            pl.BlockSpec((1, C), lambda b: (0, 0)),             # de_b
            pl.BlockSpec((1, C), lambda b: (0, 0)),             # mask_token
        ],
        out_specs=(pl.BlockSpec((1, L, E), lambda b: (b, 0, 0)),
                   pl.BlockSpec((1, L, C), lambda b: (b, 0, 0))),
        out_shape=(jax.ShapeDtypeStruct((B, L, E), jnp.float32),
                   jax.ShapeDtypeStruct((B, L, C), jnp.float32)),
        compiler_params=pltpu.CompilerParams(dimension_semantics=("parallel",)),
    )(patches, params["pe_w"], params["pe_b"], params["enc_pos_wocls"],
      vis_idx, mask_idx, params["dec_pos_wocls"], params["de_w"], params["de_b"],
      params["mask_token"])


def _block_kernel(x_ref, n1g, n1b, qkvw, qkvb, projw, projb,
                  n2g, n2b, fc1w, fc1b, fc2w, fc2b, o_ref, *, num_heads, eps):
    """One full transformer Block per batch element, fused in a single VMEM pass."""
    x = x_ref[0].astype(jnp.float32)                                # (N, D)
    N, D = x.shape
    dh = D // num_heads
    scale = dh ** -0.5

    h = _ln(x, n1g[...], n1b[...], eps)
    qkv = (jnp.dot(h.astype(MXU_DTYPE), qkvw[...].astype(MXU_DTYPE),
                   preferred_element_type=jnp.float32) + qkvb[...])  # (N, 3D)
    q, k, v = qkv[:, :D], qkv[:, D:2 * D], qkv[:, 2 * D:]
    heads = []
    for hd in range(num_heads):                                     # static lane slices
        sl = slice(hd * dh, (hd + 1) * dh)
        qh, kh, vh = q[:, sl], k[:, sl], v[:, sl]
        s = jnp.dot(qh, kh.T, preferred_element_type=jnp.float32) * scale
        s = s - jnp.max(s, axis=-1, keepdims=True)
        p = jnp.exp(s)
        p = p * pl.reciprocal(jnp.sum(p, axis=-1, keepdims=True), approx=True)
        heads.append(jnp.dot(p.astype(MXU_DTYPE), vh.astype(MXU_DTYPE),
                             preferred_element_type=jnp.float32))
    attn = jnp.concatenate(heads, axis=-1)                          # (N, D) lane-dense
    x = x + (jnp.dot(attn.astype(MXU_DTYPE), projw[...].astype(MXU_DTYPE),
                     preferred_element_type=jnp.float32) + projb[...])

    h2 = _ln(x, n2g[...], n2b[...], eps)
    h2 = (jnp.dot(h2.astype(MXU_DTYPE), fc1w[...].astype(MXU_DTYPE),
                  preferred_element_type=jnp.float32) + fc1b[...])
    # TODO(synk): nn.GELU default is exact erf; tanh approximation is used for lowering
    # robustness. This only affects the dead decoder-block branch (output discarded).
    h2 = jax.nn.gelu(h2, approximate=True)
    h2 = (jnp.dot(h2.astype(MXU_DTYPE), fc2w[...].astype(MXU_DTYPE),
                  preferred_element_type=jnp.float32) + fc2b[...])
    o_ref[0] = (x + h2).astype(o_ref.dtype)


def block_apply(x, bp, num_heads):
    B, N, D = x.shape
    w_list = [bp["n1_g"], bp["n1_b"], bp["qkv_w"], bp["qkv_b"], bp["proj_w"], bp["proj_b"],
              bp["n2_g"], bp["n2_b"], bp["fc1_w"], bp["fc1_b"], bp["fc2_w"], bp["fc2_b"]]
    in_specs = [pl.BlockSpec((1, N, D), lambda b: (b, 0, 0))]
    in_specs += [pl.BlockSpec(w.shape, lambda b: (0, 0)) for w in w_list]
    return pl.pallas_call(
        functools.partial(_block_kernel, num_heads=num_heads, eps=LN_EPS),
        grid=(B,),
        in_specs=in_specs,
        out_specs=pl.BlockSpec((1, N, D), lambda b: (b, 0, 0)),
        out_shape=jax.ShapeDtypeStruct((B, N, D), jnp.float32),
        compiler_params=pltpu.CompilerParams(dimension_semantics=("parallel",)),
    )(x, *w_list)


def _loss_kernel(xfull_ref, dng, dnb, tok_ref, devw, devb, mask_ref, o_ref, *, eps):
    """decoder_norm(x_full), decoder_embed_vanilla(x_encoder) and the masked MSE
    reduction fused; two scalars accumulated in SMEM across the batch grid axis."""
    @pl.when(pl.program_id(0) == 0)
    def _():
        o_ref[0] = jnp.float32(0.0)
        o_ref[1] = jnp.float32(0.0)

    xf = xfull_ref[0].astype(jnp.float32)                           # (L, C)
    pred = _ln(xf, dng[...], dnb[...], eps)
    tgt = (jnp.dot(tok_ref[0], devw[...], preferred_element_type=jnp.float32)
           + devb[...])                                             # (L, C)
    d = pred - tgt
    m = mask_ref[0]                                                 # (L, 1)
    o_ref[0] += jnp.sum(d * d * m)                                  # masked squared error
    o_ref[1] += jnp.sum(m)                                          # mask.sum()


def norm_proj_loss(x_full, tok, mask3, params):
    B, L, C = x_full.shape
    E = tok.shape[2]
    return pl.pallas_call(
        functools.partial(_loss_kernel, eps=LN_EPS),
        grid=(B,),
        in_specs=[
            pl.BlockSpec((1, L, C), lambda b: (b, 0, 0)),       # x_full
            pl.BlockSpec((1, C), lambda b: (0, 0)),             # decoder_norm gamma
            pl.BlockSpec((1, C), lambda b: (0, 0)),             # decoder_norm beta
            pl.BlockSpec((1, L, E), lambda b: (b, 0, 0)),       # x_encoder tokens
            pl.BlockSpec((E, C), lambda b: (0, 0)),             # dev_w
            pl.BlockSpec((1, C), lambda b: (0, 0)),             # dev_b
            pl.BlockSpec((1, L, 1), lambda b: (b, 0, 0)),       # mask
        ],
        out_specs=pl.BlockSpec(memory_space=pltpu.MemorySpace.SMEM),
        out_shape=jax.ShapeDtypeStruct((2,), jnp.float32),
        compiler_params=pltpu.CompilerParams(dimension_semantics=("arbitrary",)),
    )(x_full, params["dn_g"], params["dn_b"], tok,
      params["dev_w"], params["dev_b"], mask3)


# ------------------------------ model pieces --------------------------------

def get_1d_sincos_pos_embed_from_grid(embed_dim, pos):
    omega = np.arange(embed_dim // 2, dtype=np.float64)
    omega /= embed_dim / 2.0
    omega = 1.0 / 10000 ** omega
    pos = pos.reshape(-1)
    out = np.einsum("m,d->md", pos, omega)
    return np.concatenate([np.sin(out), np.cos(out)], axis=1)


def get_2d_sincos_pos_embed(embed_dim, grid_size, cls_token=False):
    grid_h = np.arange(grid_size, dtype=np.float32)
    grid_w = np.arange(grid_size, dtype=np.float32)
    grid = np.meshgrid(grid_w, grid_h)
    grid = np.stack(grid, axis=0).reshape([2, 1, grid_size, grid_size])
    emb_h = get_1d_sincos_pos_embed_from_grid(embed_dim // 2, grid[0])
    emb_w = get_1d_sincos_pos_embed_from_grid(embed_dim // 2, grid[1])
    pos_embed = np.concatenate([emb_h, emb_w], axis=1)
    if cls_token:
        pos_embed = np.concatenate([np.zeros([1, embed_dim]), pos_embed], axis=0)
    return pos_embed


def patchify(imgs, p):
    B, C, H, W = imgs.shape
    h = w = H // p
    x = imgs.reshape(B, C, h, p, w, p)
    x = jnp.einsum("nchpwq->nhwpqc", x)
    return x.reshape(B, h * w, p * p * C)


def mae_head_forward(imgs, params, cfg, mask3, vis_idx, mask_idx,
                     run_dead_decoder_blocks=False):
    """Returns (loss, last_dead_block_output_or_None). The decoder blocks never feed
    the reference output (decoder_norm runs on x_full), so dropping them preserves
    forward semantics exactly; the flag keeps the faithful compute path available."""
    p = cfg["patch_size"]
    patches = patchify(imgs, p)                                     # (B, L, p*p*3)

    # Fused: stand-in encoder + visible-token gather + decoder_embed + x_full assembly.
    tok, x_full = encode_and_build(patches, vis_idx, mask_idx, params)

    dead = None
    if run_dead_decoder_blocks:
        # Faithful to the reference bug: each block runs on x_full, result discarded.
        for bp in params["blocks"]:
            dead = block_apply(x_full, bp, cfg["decoder_num_heads"])

    # Fused decoder_norm + decoder_embed_vanilla projection + masked MSE reduction.
    sums = norm_proj_loss(x_full, tok, mask3, params)
    l2_loss = sums[0] / (sums[1] + 1e-5)
    clip_dist_loss = 0.0                                            # clip_criterion is None
    return l2_loss + clip_dist_loss, dead


# ------------------------------ parameter init ------------------------------

def init_params(key, cfg):
    E = cfg["embed_dim"]
    C = cfg["decoder_embed_dim"]
    L = cfg["num_patches"]
    p = cfg["patch_size"]
    ic = cfg["in_chans"]
    hid = int(C * cfg["mlp_ratio"])
    depth = cfg["decoder_depth"]
    gs = int(L ** 0.5)
    ks = jax.random.split(key, 4 + 4 * depth)

    def w(k, shape):
        return 0.02 * jax.random.normal(k, shape, jnp.float32)

    params = {
        "enc_pos_wocls": jnp.asarray(
            get_2d_sincos_pos_embed(E, gs, True)[1:], jnp.float32),      # (L, E)
        "dec_pos_wocls": jnp.asarray(
            get_2d_sincos_pos_embed(C, gs, True)[1:], jnp.float32),      # (L, C)
        "pe_w": w(ks[0], (p * p * ic, E)), "pe_b": jnp.zeros((1, E), jnp.float32),
        "de_w": w(ks[1], (E, C)), "de_b": jnp.zeros((1, C), jnp.float32),
        "dev_w": w(ks[2], (E, C)), "dev_b": jnp.zeros((1, C), jnp.float32),
        "mask_token": w(ks[3], (1, C)),
        "dn_g": jnp.ones((1, C), jnp.float32), "dn_b": jnp.zeros((1, C), jnp.float32),
        "blocks": [],
    }
    idx = 4
    for _ in range(depth):
        bk = ks[idx:idx + 4]
        idx += 4
        params["blocks"].append({
            "n1_g": jnp.ones((1, C), jnp.float32), "n1_b": jnp.zeros((1, C), jnp.float32),
            "qkv_w": w(bk[0], (C, 3 * C)), "qkv_b": jnp.zeros((1, 3 * C), jnp.float32),
            "proj_w": w(bk[1], (C, C)), "proj_b": jnp.zeros((1, C), jnp.float32),
            "n2_g": jnp.ones((1, C), jnp.float32), "n2_b": jnp.zeros((1, C), jnp.float32),
            "fc1_w": w(bk[2], (C, hid)), "fc1_b": jnp.zeros((1, hid), jnp.float32),
            "fc2_w": w(bk[3], (hid, C)), "fc2_b": jnp.zeros((1, C), jnp.float32),
        })
    return params


# ----------------------------------- main ------------------------------------

if __name__ == "__main__":
    # Lane-dense feature dims (128) so every kernel output BlockSpec ends on full lanes.
    cfg = dict(in_chans=3, patch_size=4, num_patches=16, embed_dim=128,
               decoder_embed_dim=128, decoder_num_heads=4, mlp_ratio=4.0,
               decoder_depth=2, mask_ratio=0.5)
    B = 2
    L = cfg["num_patches"]
    H = cfg["patch_size"] * int(L ** 0.5)                           # 16x16 image

    key = jax.random.PRNGKey(0)
    k_img, k_par = jax.random.split(key)
    imgs = jax.random.normal(k_img, (B, cfg["in_chans"], H, H), jnp.float32)
    params = init_params(k_par, cfg)

    # Deterministic version of MAEHead.random_masking (reference uses np.random.shuffle).
    rng = np.random.default_rng(0)
    num_mask = int(cfg["mask_ratio"] * L)
    mask = np.zeros((B, L), dtype=bool)
    for i in range(B):
        m = np.hstack([np.zeros(L - num_mask), np.ones(num_mask)])
        rng.shuffle(m)
        mask[i] = m.astype(bool)
    vis_idx = jnp.asarray(
        np.stack([np.nonzero(~mask[i])[0] for i in range(B)])[..., None], jnp.int32)
    mask_idx = jnp.asarray(
        np.stack([np.nonzero(mask[i])[0] for i in range(B)])[..., None], jnp.int32)
    mask3 = jnp.asarray(mask[:, :, None].astype(np.float32))        # (B, L, 1)

    # Perf-optimal path (dead decoder blocks dropped — output is identical).
    loss_fast, _ = mae_head_forward(imgs, params, cfg, mask3, vis_idx, mask_idx,
                                    run_dead_decoder_blocks=False)
    # Faithful path: also exercises the fused transformer-block kernel.
    loss_faithful, dead = mae_head_forward(imgs, params, cfg, mask3, vis_idx, mask_idx,
                                           run_dead_decoder_blocks=True)
    jax.block_until_ready((loss_fast, loss_faithful, dead))
    print("KERNEL_OK")
</pallas_src>

<mosaic_0001>
module attributes {stable_mosaic.version = 11 : i64} {
  func.func @_encode_build_kernel(%arg0: i32, %arg1: memref<1x16x48xf32, #tpu.memory_space<vmem>>, %arg2: memref<48x128xf32, #tpu.memory_space<vmem>>, %arg3: memref<1x128xf32, #tpu.memory_space<vmem>>, %arg4: memref<16x128xf32, #tpu.memory_space<vmem>>, %arg5: memref<1x8x1xi32, #tpu.memory_space<vmem>>, %arg6: memref<1x8x1xi32, #tpu.memory_space<vmem>>, %arg7: memref<16x128xf32, #tpu.memory_space<vmem>>, %arg8: memref<128x128xf32, #tpu.memory_space<vmem>>, %arg9: memref<1x128xf32, #tpu.memory_space<vmem>>, %arg10: memref<1x128xf32, #tpu.memory_space<vmem>>, %arg11: memref<1x16x128xf32, #tpu.memory_space<vmem>>, %arg12: memref<1x16x128xf32, #tpu.memory_space<vmem>>) attributes {dimension_semantics = [#tpu.dimension_semantics<parallel>], iteration_bounds = array<i64: 2>, scalar_prefetch = 0 : i64, scratch_operands = 0 : i64, tpu.core_type = #tpu.core_type<tc>, window_params = [{transform_indices = @transform_0, window_bounds = array<i64: 1, 16, 48>}, {pipeline_mode = #tpu.pipeline_mode<synchronous>, transform_indices = @transform_1, window_bounds = array<i64: 48, 128>}, {pipeline_mode = #tpu.pipeline_mode<synchronous>, transform_indices = @transform_2, window_bounds = array<i64: 1, 128>}, {pipeline_mode = #tpu.pipeline_mode<synchronous>, transform_indices = @transform_3, window_bounds = array<i64: 16, 128>}, {transform_indices = @transform_4, window_bounds = array<i64: 1, 8, 1>}, {transform_indices = @transform_5, window_bounds = array<i64: 1, 8, 1>}, {pipeline_mode = #tpu.pipeline_mode<synchronous>, transform_indices = @transform_6, window_bounds = array<i64: 16, 128>}, {pipeline_mode = #tpu.pipeline_mode<synchronous>, transform_indices = @transform_7, window_bounds = array<i64: 128, 128>}, {pipeline_mode = #tpu.pipeline_mode<synchronous>, transform_indices = @transform_8, window_bounds = array<i64: 1, 128>}, {pipeline_mode = #tpu.pipeline_mode<synchronous>, transform_indices = @transform_9, window_bounds = array<i64: 1, 128>}, {transform_indices = @transform_10, window_bounds = array<i64: 1, 16, 128>}, {transform_indices = @transform_11, window_bounds = array<i64: 1, 16, 128>}]} {
    %c0 = arith.constant 0 : index
    %c0_0 = arith.constant 0 : index
    %c0_1 = arith.constant 0 : index
    %0 = vector.load %arg1[%c0, %c0_0, %c0_1] : memref<1x16x48xf32, #tpu.memory_space<vmem>>, vector<1x16x48xf32>
    %1 = vector.shape_cast %0 : vector<1x16x48xf32> to vector<16x48xf32>
    %c0_2 = arith.constant 0 : index
    %c0_3 = arith.constant 0 : index
    %2 = vector.load %arg2[%c0_2, %c0_3] : memref<48x128xf32, #tpu.memory_space<vmem>>, vector<48x128xf32>
    %cst = arith.constant dense<0.000000e+00> : vector<16x128xf32>
    %3 = tpu.matmul %1, %2, %cst {dimension_numbers = #tpu.dot_dimension_numbers<[1], [0], [0], [1], [0, 0, 1, 1], [], []>} : vector<16x48xf32>, vector<48x128xf32>, vector<16x128xf32> -> vector<16x128xf32>
    %c0_4 = arith.constant 0 : index
    %c0_5 = arith.constant 0 : index
    %4 = vector.load %arg3[%c0_4, %c0_5] : memref<1x128xf32, #tpu.memory_space<vmem>>, vector<1x128xf32>
    %5 = vector.broadcast %4 : vector<1x128xf32> to vector<16x128xf32>
    %6 = arith.addf %3, %5 : vector<16x128xf32>
    %c0_6 = arith.constant 0 : index
    %c0_7 = arith.constant 0 : index
    %7 = vector.load %arg4[%c0_6, %c0_7] : memref<16x128xf32, #tpu.memory_space<vmem>>, vector<16x128xf32>
    %8 = arith.addf %6, %7 : vector<16x128xf32>
    %c0_8 = arith.constant 0 : index
    %c0_9 = arith.constant 0 : index
    %c0_10 = arith.constant 0 : index
    %9 = vector.load %arg11[%c0_8, %c0_9, %c0_10] : memref<1x16x128xf32, #tpu.memory_space<vmem>>, vector<1x16x128xf32>
    %10 = vector.shape_cast %9 : vector<1x16x128xf32> to vector<16x128xf32>
    %11 = vector.shape_cast %8 : vector<16x128xf32> to vector<1x16x128xf32>
    tpu.vector_store %arg11[%c0_8, %c0_9, %c0_10], %11 {strides = array<i32>} : memref<1x16x128xf32, #tpu.memory_space<vmem>>, vector<1x16x128xf32>,
    %c0_11 = arith.constant 0 : index
    %c0_12 = arith.constant 0 : index
    %c0_13 = arith.constant 0 : index
    %12 = vector.load %arg5[%c0_11, %c0_12, %c0_13] : memref<1x8x1xi32, #tpu.memory_space<vmem>>, vector<1x8x1xi32>
    %13 = vector.shape_cast %12 : vector<1x8x1xi32> to vector<8x1xi32>
    %c0_14 = arith.constant 0 : index
    %c0_15 = arith.constant 0 : index
    %c0_16 = arith.constant 0 : index
    %14 = vector.load %arg6[%c0_14, %c0_15, %c0_16] : memref<1x8x1xi32, #tpu.memory_space<vmem>>, vector<1x8x1xi32>
    %15 = vector.shape_cast %14 : vector<1x8x1xi32> to vector<8x1xi32>
    %16 = tpu.iota {dimensions = array<i32: 1>} : vector<8x16xi32>
    %17 = vector.broadcast %13 : vector<8x1xi32> to vector<8x16xi32>
    %18 = arith.cmpi eq, %16, %17 : vector<8x16xi32>
    %19 = arith.extui %18 : vector<8x16xi1> to vector<8x16xi32>
    %20 = arith.sitofp %19 : vector<8x16xi32> to vector<8x16xf32>
    %21 = tpu.iota {dimensions = array<i32: 1>} : vector<8x16xi32>
    %22 = vector.broadcast %15 : vector<8x1xi32> to vector<8x16xi32>
    %23 = arith.cmpi eq, %21, %22 : vector<8x16xi32>
    %24 = arith.extui %23 : vector<8x16xi1> to vector<8x16xi32>
    %25 = arith.sitofp %24 : vector<8x16xi32> to vector<8x16xf32>
    %c0_17 = arith.constant 0 : index
    %c0_18 = arith.constant 0 : index
    %26 = vector.load %arg7[%c0_17, %c0_18] : memref<16x128xf32, #tpu.memory_space<vmem>>, vector<16x128xf32>
    %cst_19 = arith.constant dense<0.000000e+00> : vector<8x128xf32>
    %27 = tpu.matmul %20, %8, %cst_19 {dimension_numbers = #tpu.dot_dimension_numbers<[1], [0], [0], [1], [0, 0, 1, 1], [], []>} : vector<8x16xf32>, vector<16x128xf32>, vector<8x128xf32> -> vector<8x128xf32>
    %cst_20 = arith.constant dense<0.000000e+00> : vector<8x128xf32>
    %28 = tpu.matmul %20, %26, %cst_20 {dimension_numbers = #tpu.dot_dimension_numbers<[1], [0], [0], [1], [0, 0, 1, 1], [], []>} : vector<8x16xf32>, vector<16x128xf32>, vector<8x128xf32> -> vector<8x128xf32>
    %cst_21 = arith.constant dense<0.000000e+00> : vector<8x128xf32>
    %29 = tpu.matmul %25, %26, %cst_21 {dimension_numbers = #tpu.dot_dimension_numbers<[1], [0], [0], [1], [0, 0, 1, 1], [], []>} : vector<8x16xf32>, vector<16x128xf32>, vector<8x128xf32> -> vector<8x128xf32>
    %c0_22 = arith.constant 0 : index
    %c0_23 = arith.constant 0 : index
    %30 = vector.load %arg8[%c0_22, %c0_23] : memref<128x128xf32, #tpu.memory_space<vmem>>, vector<128x128xf32>
    %cst_24 = arith.constant dense<0.000000e+00> : vector<8x128xf32>
    %31 = tpu.matmul %27, %30, %cst_24 {dimension_numbers = #tpu.dot_dimension_numbers<[1], [0], [0], [1], [0, 0, 1, 1], [], []>} : vector<8x128xf32>, vector<128x128xf32>, vector<8x128xf32> -> vector<8x128xf32>
    %c0_25 = arith.constant 0 : index
    %c0_26 = arith.constant 0 : index
    %32 = vector.load %arg9[%c0_25, %c0_26] : memref<1x128xf32, #tpu.memory_space<vmem>>, vector<1x128xf32>
    %33 = vector.broadcast %32 : vector<1x128xf32> to vector<8x128xf32>
    %34 = arith.addf %31, %33 : vector<8x128xf32>
    %35 = arith.addf %34, %28 : vector<8x128xf32>
    %c0_27 = arith.constant 0 : index
    %c0_28 = arith.constant 0 : index
    %36 = vector.load %arg10[%c0_27, %c0_28] : memref<1x128xf32, #tpu.memory_space<vmem>>, vector<1x128xf32>
    %37 = vector.broadcast %36 : vector<1x128xf32> to vector<8x128xf32>
    %38 = arith.addf %37, %29 : vector<8x128xf32>
    %c0_29 = arith.constant 0 : index
    %c0_30 = arith.constant 0 : index
    %c0_31 = arith.constant 0 : index
    %39 = vector.load %arg12[%c0_29, %c0_30, %c0_31] : memref<1x16x128xf32, #tpu.memory_space<vmem>>, vector<1x8x128xf32>
    %40 = vector.shape_cast %39 : vector<1x8x128xf32> to vector<8x128xf32>
    %41 = vector.shape_cast %35 : vector<8x128xf32> to vector<1x8x128xf32>
    tpu.vector_store %arg12[%c0_29, %c0_30, %c0_31], %41 {strides = array<i32>} : memref<1x16x128xf32, #tpu.memory_space<vmem>>, vector<1x8x128xf32>,
    %c0_32 = arith.constant 0 : index
    %c8 = arith.constant 8 : index
    %c0_33 = arith.constant 0 : index
    %42 = vector.load %arg12[%c0_32, %c8, %c0_33] : memref<1x16x128xf32, #tpu.memory_space<vmem>>, vector<1x8x128xf32>
    %43 = vector.shape_cast %42 : vector<1x8x128xf32> to vector<8x128xf32>
    %44 = vector.shape_cast %38 : vector<8x128xf32> to vector<1x8x128xf32>
    tpu.vector_store %arg12[%c0_32, %c8, %c0_33], %44 {strides = array<i32>} : memref<1x16x128xf32, #tpu.memory_space<vmem>>, vector<1x8x128xf32>,
    return
  }
  func.func @transform_0(%arg0: i32) -> (i32, i32, i32) {
    %c0_i32 = arith.constant 0 : i32
    %c0_i32_0 = arith.constant 0 : i32
    %c0_i32_1 = arith.constant 0 : i32
    return %arg0, %c0_i32, %c0_i32_0 : i32, i32, i32
  }
  func.func @transform_1(%arg0: i32) -> (i32, i32) {
    %c0_i32 = arith.constant 0 : i32
    %c0_i32_0 = arith.constant 0 : i32
    %c0_i32_1 = arith.constant 0 : i32
    return %c0_i32, %c0_i32_0 : i32, i32
  }
  func.func @transform_2(%arg0: i32) -> (i32, i32) {
    %c0_i32 = arith.constant 0 : i32
    %c0_i32_0 = arith.constant 0 : i32
    %c0_i32_1 = arith.constant 0 : i32
    return %c0_i32, %c0_i32_0 : i32, i32
  }
  func.func @transform_3(%arg0: i32) -> (i32, i32) {
    %c0_i32 = arith.constant 0 : i32
    %c0_i32_0 = arith.constant 0 : i32
    %c0_i32_1 = arith.constant 0 : i32
    return %c0_i32, %c0_i32_0 : i32, i32
  }
  func.func @transform_4(%arg0: i32) -> (i32, i32, i32) {
    %c0_i32 = arith.constant 0 : i32
    %c0_i32_0 = arith.constant 0 : i32
    %c0_i32_1 = arith.constant 0 : i32
    return %arg0, %c0_i32, %c0_i32_0 : i32, i32, i32
  }
  func.func @transform_5(%arg0: i32) -> (i32, i32, i32) {
    %c0_i32 = arith.constant 0 : i32
    %c0_i32_0 = arith.constant 0 : i32
    %c0_i32_1 = arith.constant 0 : i32
    return %arg0, %c0_i32, %c0_i32_0 : i32, i32, i32
  }
  func.func @transform_6(%arg0: i32) -> (i32, i32) {
    %c0_i32 = arith.constant 0 : i32
    %c0_i32_0 = arith.constant 0 : i32
    %c0_i32_1 = arith.constant 0 : i32
    return %c0_i32, %c0_i32_0 : i32, i32
  }
  func.func @transform_7(%arg0: i32) -> (i32, i32) {
    %c0_i32 = arith.constant 0 : i32
    %c0_i32_0 = arith.constant 0 : i32
    %c0_i32_1 = arith.constant 0 : i32
    return %c0_i32, %c0_i32_0 : i32, i32
  }
  func.func @transform_8(%arg0: i32) -> (i32, i32) {
    %c0_i32 = arith.constant 0 : i32
    %c0_i32_0 = arith.constant 0 : i32
    %c0_i32_1 = arith.constant 0 : i32
    return %c0_i32, %c0_i32_0 : i32, i32
  }
  func.func @transform_9(%arg0: i32) -> (i32, i32) {
    %c0_i32 = arith.constant 0 : i32
    %c0_i32_0 = arith.constant 0 : i32
    %c0_i32_1 = arith.constant 0 : i32
    return %c0_i32, %c0_i32_0 : i32, i32
  }
  func.func @transform_10(%arg0: i32) -> (i32, i32, i32) {
    %c0_i32 = arith.constant 0 : i32
    %c0_i32_0 = arith.constant 0 : i32
    %c0_i32_1 = arith.constant 0 : i32
    return %arg0, %c0_i32, %c0_i32_0 : i32, i32, i32
  }
  func.func @transform_11(%arg0: i32) -> (i32, i32, i32) {
    %c0_i32 = arith.constant 0 : i32
    %c0_i32_0 = arith.constant 0 : i32
    %c0_i32_1 = arith.constant 0 : i32
    return %arg0, %c0_i32, %c0_i32_0 : i32, i32, i32
  }
}

</mosaic_0001>

<bundles_post_ra>
// kernel: tpu_custom_call.1
= control target key start
LH: loop header
LB: loop body
LE: loop exit
PB: predicated region body
PF: predicated region fallthrough
CT: control target
= control target key end

     0   :  { %s1925_s0 = inlined_call_operand.vmem [shape: f32[2,16,48], index: 0, kind: input, shape index: {}]   ;;  %s1926_s1 = inlined_call_operand.hbm [shape: f32[48,128], index: 1, kind: input, shape index: {}]   ;;  %s1927_s2 = inlined_call_operand.vmem [shape: f32[1,128], index: 2, kind: input, shape index: {}]   ;;  %s1928_s3 = inlined_call_operand.hbm [shape: f32[16,128], index: 3, kind: input, shape index: {}]   ;;  %s1929_s4 = inlined_call_operand.vmem [shape: s32[2,8,1], index: 4, kind: input, shape index: {}]   ;;  %s1930_s5 = inlined_call_operand.vmem [shape: s32[2,8,1], index: 5, kind: input, shape index: {}]   ;;  %s1931_s6 = inlined_call_operand.hbm [shape: f32[16,128], index: 6, kind: input, shape index: {}]   ;;  %s1932_s7 = inlined_call_operand.hbm [shape: f32[128,128], index: 7, kind: input, shape index: {}]   ;;  %s1933_s8 = inlined_call_operand.vmem [shape: f32[1,128], index: 8, kind: input, shape index: {}]   ;;  %s1934_s9 = inlined_call_operand.vmem [shape: f32[1,128], index: 9, kind: input, shape index: {}]   ;;  %s1935_s10 = inlined_call_operand.hbm [shape: f32[2,16,128], index: 10, kind: output, shape index: {0}]   ;;  %s1936_s11 = inlined_call_operand.hbm [shape: f32[2,16,128], index: 11, kind: output, shape index: {1}]  }
   0x1   :  { %1939 = sst [smem:[#allocation20_spill]] %s1925_s0 }
   0x2   :  { %1940 = sst [smem:[#allocation21_spill]] %s1926_s1 }
   0x3   :  { %17 = vsyncpa [#allocation3], 0 }
   0x4   :  { %18 = vsyncpa [#allocation6], 0 }
   0x5   :  { %19 = vsyncpa [#allocation9], 0 }
   0x6   :  { %20 = vsyncpa [#allocation4], 0 }
   0x7   :  { %22 = vsyncpa [#allocation4 + $0x1], 0 }
   0x8   :  { %23 = vsyncpa [#allocation12], 0 }
   0x9   :  { %25 = vsyncpa [#allocation12 + $0x1], 0  ;;  %s1643_s17 = smov 0   ;;  %s1645_s18 = smov 0  }
   0xa   :  { %s1647_s19 = smov 0   ;;  %s1649_s20 = smov 0  }
   0xb LB: > { %1941 = sst [smem:[#allocation18_spill]] %s1564_s19  ;;  %s1664_s21 = sadd.s32 4294967295, %s1568_s20   ;;  %s1568_s20 = sphi %s1649_s20, %s1955_s20   ;;  %s1564_s19 = sphi %s1647_s19, %s1952_s19   ;;  %s1560_s18 = sphi %s1645_s18, %s1954_s18   ;;  %s1556_s17 = sphi %s1643_s17, %s1953_s17  }
   0xc   : > { %s1125_s22 = sadd.s32 4294967294, %s1568_s20   ;;  %s1668_s23 = sadd.s32 1, %s1568_s20  }
   0xd   : > { %s263_s24 = sadd.s32 1, %s1564_s19  ;;  %s260_s25 = ssub.s32 %s1568_s20, %s1668_s23 }
   0xe   : > { %p273_p0 = scmp.ne.s32.totalorder %s1564_s19, %s1560_s18  ;;  %p261_p1 = scmp.eq.s32.totalorder %s260_s25, 0 }
   0xf   : > { %p274_p2 = scmp.eq.s32.totalorder %s1664_s21, 1  ;;  %p279_p3 = scmp.ne.s32.totalorder %s1560_s18, %s1556_s17 }
  0x10   : > { %p280_p4 = scmp.eq.s32.totalorder %s1125_s22, 1  ;;  %p1126_p7 = scmp.ge.s32.totalorder %s1568_s20, 1 }
  0x11   : > { %s1679_s26 = scalar_select %p261_p1, %s1564_s19, %s263_s24  }
  0x12   : > { %p1681_p5 = por %p274_p2, %p273_p0  ;;  %p1685_p6 = por %p280_p4, %p279_p3 }
  0x13   : > { %1942 = sst [smem:[#allocation19_spill]] %s1679_s26  ;;  %p313_p8 = scmp.lt.s32.totalorder %s1568_s20, 3 }
  0x14   : > { %p1309_p9 = scmp.eq.s32.totalorder %s1664_s21, 0  ;;  %s1570_s30 = smov [#allocation5]  }
  0x15   : > { %p1692_p10 = pnand %p1126_p7, %p313_p8  ;;  %s341_s12 = sshll.u32 %s1570_s30, 4  ;;  %s342_s12 = int_to_ptr.vmem [resolvable:$true] %s341_s12 }
  0x16   : > { %s1571_s14 = smov [#allocation2]   ;;  %s1572_s16 = smov [#allocation7]  }
  0x17   : > { %p1289_p11 = pneg %p1692_p10  ;;  %s325_s15 = sshll.u32 %s1571_s14, 4  ;;  %s326_s15 = int_to_ptr.vmem [resolvable:$true] %s325_s15 }
  0x18   : > { %s354_s22 = sshll.u32 %s1572_s16, 4  ;;  %s1373_s24 = scalar_lea.vmem %s342_s12, 256  ;;  %s355_s22 = int_to_ptr.vmem [resolvable:$true] %s354_s22 }
  0x19   : > { %p1700_p12 = pnand %p1309_p9, %p1289_p11  ;;  %p1374_p0 = scmp.ne.s32.totalorder %s342_s12, %s1373_s24 }
  0x1a   : > { %p1381_p3 = scmp.lt.s32.totalorder %s342_s12, %s342_s12  ;;  %p1382_p4 = scmp.lt.s32.totalorder %s1373_s24, %s1373_s24 }
  0x1b   : > { %p1364_p13 = pneg %p1700_p12 }
  0x1c   : > { %p1383_p7 = por %p1382_p4, %p1381_p3 }
  0x1d   : > { %p1376_p1 = pnand %p1374_p0, %p1364_p13 }
  0x1f   : > { %p1377_p2 = pneg %p1376_p1 }
  0x21   : > { %p1384_p8 = pnand %p1383_p7, %p1377_p2 }
  0x23   : > { %1387 = shalt.err (!%p1384_p8)
}
  0x24   : > { %s1573_s25 = smov 128   ;;  %s1574_s30 = smov 8  }
  0x25   : > { %1295 = dma.hbm_to_vmem [thread:$0]  (!%p1700_p12), %s1928_s3, 256, %s342_s12, [#allocation6], %s1573_s25, %s1573_s25, %s1574_s30  }
  0x26   : > { %s1399_s26 = scalar_lea.vmem %s326_s15, 768  ;;  %p1407_p2 = scmp.lt.s32.totalorder %s326_s15, %s326_s15 }
  0x27   : > { %p1400_p11 = scmp.ne.s32.totalorder %s326_s15, %s1399_s26  ;;  %p1408_p3 = scmp.lt.s32.totalorder %s1399_s26, %s1399_s26 }
  0x29   : > { %p1402_p0 = pnand %p1400_p11, %p1364_p13  ;;  %p1409_p4 = por %p1408_p3, %p1407_p2 }
  0x2b   : > { %p1403_p1 = pneg %p1402_p0 }
  0x2d   : > { %p1410_p7 = pnand %p1409_p4, %p1403_p1 }
  0x2f   : > { %1413 = shalt.err (!%p1410_p7)
}
  0x30   : > { %s1947_s1 = sld [smem:[#allocation21_spill]]  ;;  %s1425_s12 = scalar_lea.vmem %s355_s22, 256 }
  0x31   : > { %p1426_p8 = scmp.ne.s32.totalorder %s355_s22, %s1425_s12  ;;  %p1433_p2 = scmp.lt.s32.totalorder %s355_s22, %s355_s22 }
  0x32   : > { %p1434_p1 = scmp.lt.s32.totalorder %s1425_s12, %s1425_s12 }
  0x33   : > { %p1428_p11 = pnand %p1426_p8, %p1364_p13 }
  0x34   : > { %p1435_p3 = por %p1434_p1, %p1433_p2 }
  0x35   : > { %p1429_p0 = pneg %p1428_p11 }
  0x36   : > { %1292 = dma.hbm_to_vmem [thread:$0]  (!%p1700_p12), %s1947_s1, 768, %s326_s15, [#allocation3], %s1573_s25, %s1573_s25, %s1574_s30  }
  0x37   : > { %p1436_p4 = pnand %p1435_p3, %p1429_p0 }
  0x39   : > { %1439 = shalt.err (!%p1436_p4)
}
  0x3a   : > { %1298 = dma.hbm_to_vmem [thread:$0]  (!%p1700_p12), %s1931_s6, 256, %s355_s22, [#allocation6], %s1573_s25, %s1573_s25, %s1574_s30  }
  0x3b   : > { %s1575_s15 = smov [#allocation8]  }
  0x3c   : > { %s367_s14 = sshll.u32 %s1575_s15, 4  ;;  %s368_s14 = int_to_ptr.vmem [resolvable:$true] %s367_s14 }
  0x3d   : > { %s1451_s16 = scalar_lea.vmem %s368_s14, 2048  ;;  %p1459_p0 = scmp.lt.s32.totalorder %s368_s14, %s368_s14 }
  0x3e   : > { %p1452_p7 = scmp.ne.s32.totalorder %s368_s14, %s1451_s16  ;;  %p1460_p2 = scmp.lt.s32.totalorder %s1451_s16, %s1451_s16 }
  0x40   : > { %p1454_p8 = pnand %p1452_p7, %p1364_p13  ;;  %p1461_p1 = por %p1460_p2, %p1459_p0 }
  0x42   : > { %p1455_p11 = pneg %p1454_p8 }
  0x44   : > { %p1462_p3 = pnand %p1461_p1, %p1455_p11 }
  0x46   : > { %1465 = shalt.err (!%p1462_p3)
}
  0x47   : > { %1301 = dma.hbm_to_vmem [thread:$0]  (!%p1700_p12), %s1932_s7, 2048, %s368_s14, [#allocation9], %s1573_s25, %s1573_s25, %s1574_s30  }
  0x48   : > { %411 = sbr.rel (%p1692_p10) target bundleno = 698 (0x2ba), region = 60 }
  0x4d   : > { %1535 = dma.done.wait (%p1309_p9), [#allocation3], 768  }
  0x4e   : > { %1537 = vsyncadd (%p1309_p9), [#allocation3], 4294966528 }
  0x4f   : > { %1539 = dma.done.wait (%p1309_p9), [#allocation6], 512  }
  0x50   : > { %1541 = vsyncadd (%p1309_p9), [#allocation6], 4294966784 }
  0x51   : > { %1543 = dma.done.wait (%p1309_p9), [#allocation9], 2048  }
  0x52   : > { %1545 = vsyncadd (%p1309_p9), [#allocation9], 4294965248  ;;  %p476_p10 = scmp.lt.s32.totalorder %s1664_s21, 1  ;;  %v1576_v0 = vmov 0   ;;  %s1948_s0 = sld [smem:[#allocation20_spill]]  ;;  %v496_v1 = vld [vmem:[#allocation2 + $0x28] sm:$0xff]  ;;  %v594_v27 = vlaneseq }
  0x53   : > { %1361 = vset.pattern.permute.xlu0 %v1576_v0  ;;  %v495_v2 = vld [vmem:[#allocation2 + $0x20] sm:$0xff]  ;;  %vm504_vm0 = vcmask 392192   ;;  %1198 = vmatprep.subr.mxu1 %v496_v1  ;;  %v494_v3 = vld [vmem:[#allocation2 + $0x18] sm:$0xff]  ;;  %v493_v6 = vld [vmem:[#allocation2 + $0x10] sm:$0xff]  ;;  %v1577_v11 = vmov 0.0   ;;  %vm1578_vm1 = vmmov 0  }
  0x54   : > { %s477_s29 = scalar_select %p476_p10, %s1664_s21, 1  ;;  %1199 = vmatpush3.msra.mxu1 %v496_v1  ;;  %v492_v8 = vld [vmem:[#allocation2 + $0x8] sm:$0xff]  ;;  %v491_v9 = vld [vmem:[#allocation2] sm:$0xff]  ;;  %1234 = vmatprep.subr.mxu0 %v1577_v11  ;;  %v840_v14 = vld [vmem:[#allocation8 + $0x68] sm:$0xff]  ;;  %v595_v29 = vand.u32 127, %v594_v27  ;;  %vm610_vm3 = vcmask 130048  }
  0x55   : > { %1200 = vmatprep.subr.mxu1 %v495_v2  ;;  %1266 = vmatprep.mubr.msk.f32.mxu0 %vm1578_vm1, %v1577_v11  ;;  %v842_v12 = vld [vmem:[#allocation8 + $0x78] sm:$0xff]  ;;  %v841_v13 = vld [vmem:[#allocation8 + $0x70] sm:$0xff]  ;;  %v839_v15 = vld [vmem:[#allocation8 + $0x60] sm:$0xff]  ;;  %s1938_s16 = sshll.u32 %s1664_s21, 8 }
  0x56   : > { %s1161_s13 = sshll.u32 %s477_s29, 4  ;;  %s1141_s25 = sshll.u32 %s477_s29, 3  ;;  %1201 = vmatpush3.msra.mxu1 %v495_v2  ;;  %1235 = vmatpush3.msra.mxu0 %v842_v12  ;;  %v838_v16 = vld [vmem:[#allocation8 + $0x58] sm:$0xff]  ;;  %v837_v17 = vld [vmem:[#allocation8 + $0x50] sm:$0xff]  ;;  %v836_v18 = vld [vmem:[#allocation8 + $0x48] sm:$0xff] }
  0x57   : > { %s484_s14 = scalar_lea.vmem %s1929_s4, %s1141_s25  ;;  %s488_s24 = scalar_lea.vmem %s1930_s5, %s1141_s25  ;;  %1202 = vmatprep.subr.mxu1 %v494_v3  ;;  %1236 = vmatprep.subr.mxu0 %v1577_v11  ;;  %v835_v19 = vld [vmem:[#allocation8 + $0x40] sm:$0xff]  ;;  %v834_v20 = vld [vmem:[#allocation8 + $0x38] sm:$0xff]  ;;  %v833_v21 = vld [vmem:[#allocation8 + $0x30] sm:$0xff] }
  0x58   : > { %s480_s19 = scalar_lea.vmem %s1948_s0, %s1161_s13  ;;  %v592_v5 = vld [vmem:[%s484_s14] sm:$0xff]  ;;  %1203 = vmatpush3.msra.mxu1 %v494_v3  ;;  %1237 = vmatpush3.msra.mxu0 %v841_v13  ;;  %v832_v22 = vld [vmem:[#allocation8 + $0x28] sm:$0xff]  ;;  %v831_v23 = vld [vmem:[#allocation8 + $0x20] sm:$0xff]  ;;  %s1799_s29 = sand.u32 1, %s1560_s18  }
  0x59   : > { %v489_v4 = vld [vmem:[%s480_s19] sm:$0xff]  ;;  %597 = vperm.xlu0 %1361, %v592_v5   ;;  %1204 = vmatprep.subr.mxu1 %v493_v6  ;;  %v490_v10 = vld [vmem:[%s480_s19 + $0x8] sm:$0xff]  ;;  %v828_v26 = vld [vmem:[#allocation8 + $0x8] sm:$0xff]  ;;  %s1137_s30 = sshll.u32 %s1799_s29, 4  ;;  %s1842_s13 = scalar_lea.hbm %s1935_s10, %s1938_s16 }
  0x5a   : > { %1210 = vmatprep.mubr.msk.f32.mxu1 %vm504_vm0, %v489_v4  ;;  %v593_v7 = vld [vmem:[%s488_s24] sm:$0xff]  ;;  %1205 = vmatpush3.msra.mxu1 %v493_v6  ;;  %v830_v24 = vld [vmem:[#allocation8 + $0x18] sm:$0xff]  ;;  %v587_v31 = vld [vmem:[#allocation5 + $0x8] sm:$0xff]  ;;  %s1807_s12 = scalar_lea.vmem [#allocation10], %s1137_s30  ;;  %s1830_s15 = scalar_lea.vmem [#allocation11], %s1137_s30 }
  0x5b   : > { %1206 = vmatprep.subr.mxu1 %v492_v8  ;;  %1238 = vmatprep.subr.mxu0 %v1577_v11  ;;  %v829_v25 = vld [vmem:[#allocation8 + $0x10] sm:$0xff]  ;;  %v586_v35 = vld [vmem:[#allocation5] sm:$0xff]  ;;  %v609_v40 = vld [vmem:[#allocation7 + $0x8] sm:$0xff]  ;;  %s950_s14 = sshll.u32 %s1807_s12, 4  ;;  %s1579_s30 = smov [#allocation10]   ;;  %s1834_s14 = int_to_ptr.vmem [resolvable:$true] %s950_s14 }
  0x5c   : > { %1207 = vmatpush3.msra.mxu1 %v492_v8  ;;  %1239 = vmatpush3.msra.mxu0 %v840_v14  ;;  %v1143_v28 = vld [vmem:[%s1927_s2] ss:$0 sm:$0xff]  ;;  %v827_v44 = vld [vmem:[#allocation8] sm:$0xff]  ;;  %s1466_s19 = scalar_lea.vmem %s1834_s14, 256 }
  0x5d   : > { %603 = vperm.xlu0 %1361, %v593_v7   ;;  %1208 = vmatprep.subr.mxu1 %v491_v9  ;;  %v608_v41 = vld [vmem:[#allocation7] sm:$0xff]  ;;  %p1467_p9 = scmp.ne.s32.totalorder %s1834_s14, %s1466_s19 }
  0x5e   : > { %1209 = vmatpush3.msra.mxu1 %v491_v9  ;;  %1240 = vmatprep.subr.mxu0 %v1577_v11  ;;  %v1152_v49 = vld [vmem:[%s1934_s9] ss:$0 sm:$0xff] }
  0x5f   : > { %1211 = vmatmul.mubr.msk.f32.vlgmr.msra.gmra.mxu1 %vm504_vm0, %v490_v10  ;;  %1213 = vmatprep.subr.mxu1 %v1577_v11  ;;  %p1468_p12 = pnand %p1467_p9, %p1681_p5 }
  0x60   : > { %1217 = vmatprep.mubr.msk.f32.mxu1 %vm1578_vm1, %v1577_v11  ;;  %1241 = vmatpush3.msra.mxu0 %v839_v15 }
  0x61   : > { %1242 = vmatprep.subr.mxu0 %v1577_v11  ;;  %p1469_p13 = pneg %p1468_p12 }
  0x62   : > { %1243 = vmatpush3.msra.mxu0 %v838_v16 }
  0x63   : > { %1244 = vmatprep.subr.mxu0 %v1577_v11 }
  0x64   : > { %1245 = vmatpush3.msra.mxu0 %v837_v17 }
  0x65   : > { %1246 = vmatprep.subr.mxu0 %v1577_v11 }
  0x66   : > { %1247 = vmatpush3.msra.mxu0 %v836_v18 }
  0x67   : > { %1248 = vmatprep.subr.mxu0 %v1577_v11 }
  0x68   : > { %1249 = vmatpush3.msra.mxu0 %v835_v19 }
  0x69   : > { %1250 = vmatprep.subr.mxu0 %v1577_v11 }
  0x6a   : > { %1251 = vmatpush3.msra.mxu0 %v834_v20 }
  0x6b   : > { %1252 = vmatprep.subr.mxu0 %v1577_v11 }
  0x6c   : > { %1253 = vmatpush3.msra.mxu0 %v833_v21 }
  0x6d   : > { %1254 = vmatprep.subr.mxu0 %v1577_v11 }
  0x6e   : > { %1255 = vmatpush3.msra.mxu0 %v832_v22 }
  0x6f   : > { %1256 = vmatprep.subr.mxu0 %v1577_v11 }
  0x70   : > { %1257 = vmatpush3.msra.mxu0 %v831_v23 }
  0x71   : > { %1258 = vmatprep.subr.mxu0 %v1577_v11 }
  0x72   : > { %1259 = vmatpush3.msra.mxu0 %v830_v24 }
  0x73   : > { %1260 = vmatprep.subr.mxu0 %v1577_v11 }
  0x74   : > { %1261 = vmatpush3.msra.mxu0 %v829_v25 }
  0x75   : > { %1262 = vmatprep.subr.mxu0 %v1577_v11 }
  0x76   : > { %1263 = vmatpush3.msra.mxu0 %v828_v26 }
  0x77   : > { %1264 = vmatprep.subr.mxu0 %v1577_v11 }
  0x78   : > { %1265 = vmatpush3.msra.mxu0 %v827_v44 }
  0xd4   : > { %v598_v33 = vpop.permute.xlu0 %597 }
  0xd5   : > { %vm599_vm2 = vcmp.eq.s32.totalorder %v595_v29, %v598_v33 }
  0xd6   : > { %v1146_v38 = vsel %vm599_vm2, 1.0, %v1577_v11 }
  0xd8   : > { %v604_v42 = vpop.permute.xlu0 %603 }
  0xd9   : > { %vm605_vm4 = vcmp.eq.s32.totalorder %v595_v29, %v604_v42 }
  0xda   : > { %v1147_v43 = vsel %vm605_vm4, 1.0, %v1577_v11 }
 0x11f   : > { %v1212_v30 = vpop.f32.mrf.mxu1 }
 0x120   : > { %v583_v32 = vadd.f32 %v1212_v30, %v1143_v28 }
 0x121   : > { %v577_v34 = vpop.f32.mrf.mxu1 }
 0x122   : > { %v589_v36 = vadd.f32 %v587_v31, %v583_v32  ;;  %v578_v37 = vadd.f32 %v1143_v28, %v577_v34 }
 0x124   : > { %591 = vst [vmem:[%s1807_s12 + $0x8] sm:$0xff] %v589_v36  ;;  %v588_v39 = vadd.f32 %v586_v35, %v578_v37  ;;  %1214 = vmatpush3.msra.mxu1 %v589_v36 }
 0x125   : > { %1215 = vmatprep.subr.mxu1 %v1577_v11 }
 0x126   : > { %590 = vst [vmem:[%s1807_s12] sm:$0xff] %v588_v39  ;;  %1216 = vmatpush3.msra.mxu1 %v588_v39  ;;  %s1470_s12 = sshll.u32 %s1579_s30, 4  ;;  %s1471_s12 = int_to_ptr.vmem [resolvable:$false] %s1470_s12 }
 0x127   : > { %1218 = vmatmul.mubr.msk.f32.vlgmr.msra.gmra.mxu1 %vm610_vm3, %v1146_v38  ;;  %1220 = vmatprep.subr.mxu1 %v1577_v11  ;;  %s1472_s26 = scalar_lea.vmem %s1471_s12, 512  ;;  %p1473_p4 = scmp.lt.s32.totalorder %s1834_s14, %s1471_s12 }
 0x128   : > { %1221 = vmatpush3.msra.mxu1 %v609_v40  ;;  %1224 = vmatprep.mubr.msk.f32.mxu1 %vm1578_vm1, %v1577_v11  ;;  %p1474_p7 = scmp.lt.s32.totalorder %s1472_s26, %s1466_s19 }
 0x129   : > { %1222 = vmatprep.subr.mxu1 %v1577_v11 }
 0x12a   : > { %1223 = vmatpush3.msra.mxu1 %v608_v41  ;;  %p1475_p8 = por %p1474_p7, %p1473_p4 }
 0x12b   : > { %1225 = vmatmul.mubr.msk.f32.vlgmr.msra.gmra.mxu1 %vm610_vm3, %v1146_v38  ;;  %1227 = vmatprep.subr.mxu1 %v1577_v11 }
 0x12c   : > { %1228 = vmatpush3.msra.mxu1 %v609_v40  ;;  %1231 = vmatprep.mubr.msk.f32.mxu1 %vm1578_vm1, %v1577_v11  ;;  %p1476_p11 = pnand %p1475_p8, %p1469_p13 }
 0x12d   : > { %1229 = vmatprep.subr.mxu1 %v1577_v11 }
 0x12e   : > { %1230 = vmatpush3.msra.mxu1 %v608_v41 }
 0x12f   : > { %1232 = vmatmul.mubr.msk.f32.vlgmr.msra.gmra.mxu1 %vm610_vm3, %v1147_v43 }
 0x1e7   : > { %v680_v45 = vpop.f32.mrf.mxu1 }
 0x1e8   : > { %1267 = vmatmul.mubr.f32.vlgmr.msra.gmra.mxu0 %v680_v45 }
 0x1e9   : > { %v1219_v46 = vpop.f32.mrf.mxu1 }
 0x1eb   : > { %v750_v47 = vpop.f32.mrf.mxu1 }
 0x1ed   : > { %v1226_v48 = vpop.f32.mrf.mxu1 }
 0x1ef   : > { %v823_v50 = vpop.f32.mrf.mxu1 }
 0x1f0   : > { %v928_v51 = vadd.f32 %v1152_v49, %v823_v50 }
 0x1f1   : > { %v1233_v52 = vpop.f32.mrf.mxu1 }
 0x1f2   : > { %930 = vst [vmem:[%s1830_s15 + $0x8] sm:$0xff] %v928_v51 }
 0x1f3   : > { %1479 = shalt.err (!%p1476_p11)
}
 0x1f4   : > { %s1480_s22 = scalar_lea.hbm %s1842_s13, 256  ;;  %s1484_s30 = scalar_lea.hbm %s1935_s10, 512 }
 0x1f5   : > { %p1481_p0 = scmp.ne.s32.totalorder %s1842_s13, %s1480_s22  ;;  %p1485_p3 = scmp.lt.s32.totalorder %s1842_s13, %s1935_s10 }
 0x1f6   : > { %p1486_p10 = scmp.lt.s32.totalorder %s1484_s30, %s1480_s22 }
 0x1f7   : > { %p1482_p2 = pnand %p1481_p0, %p1681_p5 }
 0x1f8   : > { %p1487_p9 = por %p1486_p10, %p1485_p3 }
 0x1f9   : > { %p1483_p1 = pneg %p1482_p2 }
 0x1fb   : > { %p1488_p12 = pnand %p1487_p9, %p1483_p1 }
 0x1fd   : > { %1491 = shalt.err (!%p1488_p12)
}
 0x1fe   : > { %s1580_s19 = smov 128   ;;  %s1581_s16 = smov 8   ;;  %v1151_v53 = vld [vmem:[%s1933_s8] ss:$0 sm:$0xff] }
 0x1ff   : > { %s1949_s0 = scalar_lea.sflag [#allocation4], %s1799_s29  ;;  %s966_s26 = sshll.u32 %s1830_s15, 4  ;;  %s1874_s26 = int_to_ptr.vmem [resolvable:$true] %s966_s26 }
 0x200   : > { %1285 = dma.vmem_to_hbm [thread:$0]  (%p1681_p5), %s1834_s14, 256, %s1842_s13, %s1949_s0, %s1580_s19, %s1580_s19, %s1581_s16  }
 0x201   : > { %s1950_s22 = sshll.u32 %s1664_s21, 8  ;;  %s937_s14 = scalar_lea.sflag [#allocation12], %s1799_s29 }
 0x202   : > { %s1881_s1 = scalar_lea.hbm %s1936_s11, %s1950_s22  ;;  %s1492_s13 = scalar_lea.vmem %s1874_s26, 256 }
 0x203   : > { %p1493_p13 = scmp.ne.s32.totalorder %s1874_s26, %s1492_s13  ;;  %s1582_s0 = smov [#allocation11]  }
 0x204   : > { %s1496_s25 = sshll.u32 %s1582_s0, 4  ;;  %s1497_s25 = int_to_ptr.vmem [resolvable:$false] %s1496_s25 }
 0x205   : > { %p1494_p4 = pnand %p1493_p13, %p1681_p5  ;;  %s1498_s12 = scalar_lea.vmem %s1497_s25, 512 }
 0x206   : > { %p1499_p8 = scmp.lt.s32.totalorder %s1874_s26, %s1497_s25  ;;  %p1500_p11 = scmp.lt.s32.totalorder %s1498_s12, %s1492_s13 }
 0x207   : > { %p1495_p7 = pneg %p1494_p4 }
 0x208   : > { %p1501_p0 = por %p1500_p11, %p1499_p8 }
 0x20a   : > { %p1502_p2 = pnand %p1501_p0, %p1495_p7 }
 0x2a8   : > { %v916_v54 = vpop.f32.mrf.mxu0 }
 0x2a9   : > { %v917_v55 = vadd.f32 %v1151_v53, %v916_v54 }
 0x2aa   : > { %v1268_v56 = vpop.f32.mrf.mxu0 }
 0x2ab   : > { %v920_v57 = vadd.f32 %v917_v55, %v750_v47 }
 0x2ad   : > { %929 = vst [vmem:[%s1830_s15] sm:$0xff] %v920_v57 }
 0x2ae   : > { %1505 = shalt.err (!%p1502_p2)
}
 0x2af   : > { %s1506_s21 = scalar_lea.hbm %s1881_s1, 256  ;;  %s1510_s22 = scalar_lea.hbm %s1936_s11, 512 }
 0x2b0   : > { %p1507_p1 = scmp.ne.s32.totalorder %s1881_s1, %s1506_s21  ;;  %p1511_p9 = scmp.lt.s32.totalorder %s1881_s1, %s1936_s11 }
 0x2b1   : > { %p1512_p12 = scmp.lt.s32.totalorder %s1510_s22, %s1506_s21 }
 0x2b2   : > { %p1508_p3 = pnand %p1507_p1, %p1681_p5 }
 0x2b3   : > { %p1513_p13 = por %p1512_p12, %p1511_p9 }
 0x2b4   : > { %p1509_p10 = pneg %p1508_p3 }
 0x2b6   : > { %p1514_p4 = pnand %p1513_p13, %p1509_p10 }
 0x2b8   : > { %1517 = shalt.err (!%p1514_p4)
}
 0x2b9   : > { %1286 = dma.vmem_to_hbm [thread:$0]  (%p1681_p5), %s1874_s26, 256, %s1881_s1, %s937_s14, %s1580_s19, %s1580_s19, %s1581_s16  }
 0x2ba PF: > { %p1317_p7 = scmp.ge.s32.totalorder %s1568_s20, 2  ;;  %s981_s13 = sand.u32 1, %s1556_s17  }
 0x2bb   : > { %s982_s0 = scalar_lea.sflag [#allocation4], %s981_s13 }
 0x2bc   : > { %p1303_p8 = pnand %p1317_p7, %p1685_p6 }
 0x2be   : > { %p1304_p11 = pneg %p1303_p8 }
 0x2c0   : > { %1547 = dma.done.wait (%p1304_p11), %s982_s0, 256  }
 0x2c1   : > { %1549 = vsyncadd (%p1304_p11), %s982_s0, 4294967040  ;;  %s991_s25 = scalar_lea.sflag [#allocation12], %s981_s13 }
 0x2c2   : > { %1551 = dma.done.wait (%p1304_p11), %s991_s25, 256  }
 0x2c3   : > { %1553 = vsyncadd (%p1304_p11), %s991_s25, 4294967040  ;;  %s1951_s27 = sld [smem:[#allocation18_spill]]  ;;  %p28_p5 = scmp.ge.s32.totalorder %s1668_s23, 4  }
 0x2c4   : > { %s1952_s19 = sld [smem:[#allocation19_spill]]  ;;  %s1953_s17 = smov %s1560_s18 }
 0x2c5   : > { %s1955_s20 = smov %s1668_s23  ;;  %30 = sbr.rel (!%p28_p5) target bundleno = 11 (0xb), region = 135 }
 0x2c9   : > { %s1954_s18 = smov %s1951_s27 }
 0x2ca   :  { %996 = vsyncpa [#allocation3], 1 }
 0x2cb   :  { %998 = vsyncpa [#allocation3 + $0x1], 1 }
 0x2cc   :  { %999 = vsyncpa [#allocation6], 1 }
 0x2cd   :  { %1000 = vsyncpa [#allocation9], 1 }
 0x2ce   :  { %1001 = vsyncpa [#allocation4], 1 }
 0x2cf   :  { %1003 = vsyncpa [#allocation4 + $0x1], 1 }
 0x2d0   :  { %1004 = vsyncpa [#allocation12], 1 }
 0x2d1   :  { %1006 = vsyncpa [#allocation12 + $0x1], 1 }

</bundles_post_ra>
